<compile_context>
chip_gen: v7x
topology: tpu7x:2x2x1
jax: 0.10.0
libtpu: 0.0.40
codegen_flags: <defaults>
</compile_context>

<pallas_src>
import jax
import jax.numpy as jnp
from jax import lax
from jax.experimental import pallas as pl
from jax.experimental.pallas import tpu as pltpu


def _policy_mean_t_kernel(w_ref, state_ref, mean_t_ref):
    # w_ref:      [A, S]   (resident across all grid steps, ~1 KiB)
    # state_ref:  [tm, S]  batch tile
    # mean_t_ref: [A, tm]  lane-dense output tile (tm is a multiple of 128)
    #
    # Contract over S on both operands (transposed RHS handled by Mosaic),
    # negate the MXU f32 result (one VPU op per lane-dense output vreg).
    mean_t_ref[...] = -lax.dot_general(
        w_ref[...], state_ref[...],
        dimension_numbers=(((1,), (1,)), ((), ())),
        preferred_element_type=jnp.float32,
    )


def linear_policy_forward(state, weight, log_std, *, std_clamp_max=0.5,
                          block_b=1024, min_pallas_batch=256):
    """Forward pass of LinearPolicy.

    Args:
      state:   [B, S] float32
      weight:  [A, S] float32 (PyTorch nn.Linear weight layout, NOT transposed)
      log_std: [A]    float32
      block_b: batch tile size (multiple of 128) for the Pallas path.
    Returns:
      (mean [B, A], std [A]) — the parameters of Normal(mean, std).
    """
    B, S = state.shape
    A = weight.shape[0]

    # std is 8 state-independent scalars: keep it out of the kernel.
    std = jnp.clip(jnp.exp(log_std), 1e-6, std_clamp_max)

    # Toy/latency shapes: fused XLA dot+neg beats pallas_call setup overhead.
    if B < min_pallas_batch:
        mean = -lax.dot_general(
            state, weight,
            dimension_numbers=(((1,), (1,)), ((), ())),
            preferred_element_type=jnp.float32,
        )
        return mean, std

    # Batch tile: multiple of 128 (lane-dense [A, tm] output, sublane-aligned
    # [tm, S] state tile), capped at block_b. Pad B up to a tile multiple; the
    # padded rows only produce discarded output columns.
    tm = min(block_b, pl.cdiv(B, 128) * 128)
    b_pad = pl.cdiv(B, tm) * tm
    state_p = state if b_pad == B else jnp.pad(state, ((0, b_pad - B), (0, 0)))
    grid = (b_pad // tm,)

    mean_t = pl.pallas_call(
        _policy_mean_t_kernel,
        out_shape=jax.ShapeDtypeStruct((A, b_pad), jnp.float32),
        grid=grid,
        in_specs=[
            pl.BlockSpec((A, S), lambda i: (0, 0)),    # weight (same block every step)
            pl.BlockSpec((tm, S), lambda i: (i, 0)),   # state batch tile
        ],
        out_specs=pl.BlockSpec((A, tm), lambda i: (0, i)),  # lane-dense mean^T tile
        compiler_params=pltpu.CompilerParams(
            dimension_semantics=("parallel",),          # megacore on v7x
        ),
        cost_estimate=pl.CostEstimate(
            flops=2 * b_pad * S * A,
            transcendentals=0,
            bytes_accessed=4 * (b_pad * S + A * S + A * b_pad),
        ),
    )(weight, state_p)

    # Present the conventional [B, A] layout. Consumers that can take the
    # [A, B] layout directly should use mean_t and skip this pass.
    mean = mean_t.T[:B]
    return mean, std


if __name__ == "__main__":
    STATE_DIM, ACTION_DIM = 32, 8
    INITIAL_LOG_STD = -4.0
    STD_CLAMP_MAX = 0.5

    key = jax.random.PRNGKey(0)
    k_w, k_small, k_big = jax.random.split(key, 3)

    # Deterministic parameter init (mimics nn.Linear uniform(-1/sqrt(S), 1/sqrt(S))).
    bound = 1.0 / jnp.sqrt(jnp.float32(STATE_DIM))
    weight = jax.random.uniform(
        k_w, (ACTION_DIM, STATE_DIM), minval=-bound, maxval=bound,
        dtype=jnp.float32)
    log_std = jnp.ones((ACTION_DIM,), dtype=jnp.float32) * INITIAL_LOG_STD

    def reference(s):
        m = -(s @ weight.T)
        sd = jnp.clip(jnp.exp(log_std), 1e-6, STD_CLAMP_MAX)
        return m, sd

    # 1) Small shape consistent with the module (batch=2): fused-XLA fast path.
    state_small = jax.random.normal(k_small, (2, STATE_DIM), dtype=jnp.float32)
    mean_s, std_s = linear_policy_forward(
        state_small, weight, log_std, std_clamp_max=STD_CLAMP_MAX)
    jax.block_until_ready((mean_s, std_s))
    m_ref, s_ref = reference(state_small)
    assert jnp.allclose(mean_s, m_ref, atol=1e-5, rtol=1e-5)
    assert jnp.allclose(std_s, s_ref, atol=1e-6, rtol=1e-6)

    # 2) Production-style batch: Pallas path (tm=1024, 2 grid steps, padded
    #    ragged edge, lane-dense [A, B] output).
    B_BIG = 1536
    state_big = jax.random.normal(k_big, (B_BIG, STATE_DIM), dtype=jnp.float32)
    mean_b, std_b = linear_policy_forward(
        state_big, weight, log_std, std_clamp_max=STD_CLAMP_MAX)
    jax.block_until_ready((mean_b, std_b))
    m_ref_b, s_ref_b = reference(state_big)
    assert mean_b.shape == (B_BIG, ACTION_DIM)
    assert jnp.allclose(mean_b, m_ref_b, atol=1e-5, rtol=1e-5)
    assert jnp.allclose(std_b, s_ref_b, atol=1e-6, rtol=1e-6)

    # TODO(synk): the mutable `counter` attribute and the host-side NaN-warning
    # printout are Python/host diagnostics with no Pallas equivalent; omitted.
    print("KERNEL_OK")
</pallas_src>

<mosaic_0001>
module attributes {stable_mosaic.version = 11 : i64} {
  func.func @_policy_mean_t_kernel(%arg0: i32, %arg1: memref<8x32xf32, #tpu.memory_space<vmem>>, %arg2: memref<1024x32xf32, #tpu.memory_space<vmem>>, %arg3: memref<8x1024xf32, #tpu.memory_space<vmem>>) attributes {dimension_semantics = [#tpu.dimension_semantics<parallel>], iteration_bounds = array<i64: 2>, scalar_prefetch = 0 : i64, scratch_operands = 0 : i64, tpu.core_type = #tpu.core_type<tc>, window_params = [{pipeline_mode = #tpu.pipeline_mode<synchronous>, transform_indices = @transform_0, window_bounds = array<i64: 8, 32>}, {transform_indices = @transform_1, window_bounds = array<i64: 1024, 32>}, {transform_indices = @transform_2, window_bounds = array<i64: 8, 1024>}]} {
    %c0 = arith.constant 0 : index
    %c0_0 = arith.constant 0 : index
    %0 = vector.load %arg1[%c0, %c0_0] : memref<8x32xf32, #tpu.memory_space<vmem>>, vector<8x32xf32>
    %c0_1 = arith.constant 0 : index
    %c0_2 = arith.constant 0 : index
    %1 = vector.load %arg2[%c0_1, %c0_2] : memref<1024x32xf32, #tpu.memory_space<vmem>>, vector<1024x32xf32>
    %cst = arith.constant dense<0.000000e+00> : vector<8x1024xf32>
    %2 = tpu.matmul %0, %1, %cst {dimension_numbers = #tpu.dot_dimension_numbers<[1], [1], [0], [0], [0, 0, 1, 0], [], []>} : vector<8x32xf32>, vector<1024x32xf32>, vector<8x1024xf32> -> vector<8x1024xf32>
    %cst_3 = arith.constant 0.000000e+00 : f32
    %3 = vector.broadcast %cst_3 : f32 to vector<8x1024xf32>
    %4 = arith.subf %3, %2 : vector<8x1024xf32>
    %c0_4 = arith.constant 0 : index
    %c0_5 = arith.constant 0 : index
    %5 = vector.load %arg3[%c0_4, %c0_5] : memref<8x1024xf32, #tpu.memory_space<vmem>>, vector<8x1024xf32>
    tpu.vector_store %arg3[%c0_4, %c0_5], %4 {strides = array<i32>} : memref<8x1024xf32, #tpu.memory_space<vmem>>, vector<8x1024xf32>,
    return
  }
  func.func @transform_0(%arg0: i32) -> (i32, i32) {
    %c0_i32 = arith.constant 0 : i32
    %c0_i32_0 = arith.constant 0 : i32
    %c0_i32_1 = arith.constant 0 : i32
    return %c0_i32, %c0_i32_0 : i32, i32
  }
  func.func @transform_1(%arg0: i32) -> (i32, i32) {
    %c0_i32 = arith.constant 0 : i32
    %c0_i32_0 = arith.constant 0 : i32
    return %arg0, %c0_i32 : i32, i32
  }
  func.func @transform_2(%arg0: i32) -> (i32, i32) {
    %c0_i32 = arith.constant 0 : i32
    %c0_i32_0 = arith.constant 0 : i32
    return %c0_i32, %arg0 : i32, i32
  }
}

</mosaic_0001>

<bundles_post_ra>
// kernel: tpu_custom_call.1
= control target key start
LH: loop header
LB: loop body
LE: loop exit
PB: predicated region body
PF: predicated region fallthrough
CT: control target
= control target key end

     0   :  { %7 = vsyncpa [#allocation3], 0  ;;  %s2016_s0 = inlined_call_operand.vmem [shape: f32[8,32], index: 0, kind: input, shape index: {}]   ;;  %s2017_s1 = inlined_call_operand.vmem [shape: f32[2048,32], index: 1, kind: input, shape index: {}]   ;;  %s2018_s2 = inlined_call_operand.hbm [shape: f32[8,2048], index: 2, kind: output, shape index: {}]  }
   0x1   :  { %9 = vsyncpa [#allocation3 + $0x1], 0  ;;  %s1628_s9 = smov 0   ;;  %s1630_s10 = smov 0  }
   0x2   :  { %s1632_s11 = smov 0   ;;  %s1634_s12 = smov 0  }
   0x3 LB: > { %s1649_s13 = sadd.s32 4294967295, %s1610_s12   ;;  %s1036_s14 = sadd.s32 4294967294, %s1610_s12   ;;  %s1610_s12 = sphi %s1634_s12, %s2026_s12   ;;  %s1606_s11 = sphi %s1632_s11, %s2025_s11   ;;  %s1602_s10 = sphi %s1630_s10, %s2024_s10   ;;  %s1598_s9 = sphi %s1628_s9, %s2023_s9  }
   0x4   : > { %s1653_s15 = sadd.s32 1, %s1610_s12   ;;  %s69_s16 = sadd.s32 1, %s1606_s11 }
   0x5   : > { %s66_s17 = ssub.s32 %s1610_s12, %s1653_s15  ;;  %p79_p0 = scmp.ne.s32.totalorder %s1606_s11, %s1602_s10 }
   0x6   : > { %p67_p1 = scmp.eq.s32.totalorder %s66_s17, 0  ;;  %p80_p2 = scmp.eq.s32.totalorder %s1649_s13, 1 }
   0x7   : > { %p85_p3 = scmp.ne.s32.totalorder %s1602_s10, %s1598_s9  ;;  %p86_p4 = scmp.eq.s32.totalorder %s1036_s14, 1 }
   0x8   : > { %s1664_s18 = scalar_select %p67_p1, %s1606_s11, %s69_s16  }
   0x9   : > { %p1666_p5 = por %p80_p2, %p79_p0  ;;  %p1670_p6 = por %p86_p4, %p85_p3 }
   0xa   : > { %p1039_p7 = scmp.ge.s32.totalorder %s1610_s12, 1  ;;  %p116_p8 = scmp.lt.s32.totalorder %s1610_s12, 3 }
   0xc   : > { %p117_p9 = pnand %p1039_p7, %p116_p8 }
   0xd   : > { %s1041_s21 = sshll.u32 (!%p117_p9), %s1649_s13, 7  ;;  %vm274_vm0 = vcmask (!%p117_p9), 261120   ;;  %v1680_v0 = vld [vmem:[%s2016_s0] sm:$0xff] (!%p117_p9)  ;;  %s135_s28 = sand.u32 (!%p117_p9), 1, %s1602_s10  }
   0xe   : > { %120 = sbr.rel (%p117_p9) target bundleno = 386 (0x182), region = 28  ;;  %p139_p10 = scmp.lt.s32.totalorder (!%p117_p9), %s1041_s21, 255  ;;  %1213 = vmatprep.mubr.msk.f32.mxu0 (!%p117_p9), %vm274_vm0, %v1680_v0  ;;  %1247 = vmatprep.mubr.msk.f32.mxu1 (!%p117_p9), %vm274_vm0, %v1680_v0  ;;  %vm1693_vm1 = vmpackc.low (!%p117_p9), %vm274_vm0, %vm274_vm0 }
   0xf   : > { %s1040_s29 = sshll.u32 (!%p117_p9), %s135_s28, 6  ;;  %s1180_s3 = sshll.u32 (!%p117_p9), %s1649_s13, 10 }
  0x10   : > { %s137_s30 = scalar_lea.vmem (!%p117_p9), [#allocation2], %s1040_s29  ;;  %s1972_s7 = scalar_lea.hbm (!%p117_p9), %s2018_s2, %s1180_s3 }
  0x11   : > { %s977_s4 = sshll.u32 (!%p117_p9), %s137_s30, 4  ;;  %s963_s8 = scalar_lea.sflag (!%p117_p9), [#allocation3], %s135_s28  ;;  %s1974_s4 = int_to_ptr.vmem [resolvable:$true] %s977_s4 }
  0x12   : > { %s1548_s13 = scalar_lea.vmem (!%p117_p9), %s1974_s4, 1024  ;;  %s1612_s14 = smov (!%p117_p9), [#allocation2]  }
  0x13   : > { %p1549_p11 = scmp.ne.s32.totalorder (!%p117_p9), %s1974_s4, %s1548_s13  ;;  %s1552_s16 = sshll.u32 (!%p117_p9), %s1612_s14, 4  ;;  %s1553_s16 = int_to_ptr.vmem [resolvable:$false] %s1552_s16 }
  0x14   : > { %s1554_s17 = scalar_lea.vmem (!%p117_p9), %s1553_s16, 2048  ;;  %p1555_p0 = scmp.lt.s32.totalorder (!%p117_p9), %s1974_s4, %s1553_s16 }
  0x15   : > { %s2028_s21 = smov (!%p139_p10, %s1041_s21), 255  ;;  %p1550_p12 = pnand %p1549_p11, %p1666_p5 }
  0x16   : > { %s1042_s24 = sshll.u32 %s2028_s21, 3  ;;  %p1556_p1 = scmp.lt.s32.totalorder %s1554_s17, %s1548_s13 }
  0x17   : > { %s1689_s27 = scalar_lea.vmem %s2017_s1, %s1042_s24  ;;  %p1551_p13 = pneg %p1550_p12 }
  0x18   : > { %v162_v2 = vld [vmem:[%s1689_s27 + $0x80] sm:$0xff]  ;;  %v163_v3 = vld [vmem:[%s1689_s27 + $0x88] sm:$0xff]  ;;  %v164_v13 = vld [vmem:[%s1689_s27 + $0x90] sm:$0xff]  ;;  %p1557_p2 = por %p1556_p1, %p1555_p0 }
  0x19   : > { %v194_v4 = vld [vmem:[%s1689_s27 + $0x180] sm:$0xff]  ;;  %v1317_v5 = vpack.c.bf16 %v163_v3, %v162_v2  ;;  %v195_v6 = vld [vmem:[%s1689_s27 + $0x188] sm:$0xff]  ;;  %v165_v15 = vld [vmem:[%s1689_s27 + $0x98] sm:$0xff] }
  0x1a   : > { %v146_v7 = vld [vmem:[%s1689_s27] sm:$0xff]  ;;  %v147_v8 = vld [vmem:[%s1689_s27 + $0x8] sm:$0xff]  ;;  %v1365_v9 = vpack.c.bf16 %v195_v6, %v194_v4  ;;  %v196_v16 = vld [vmem:[%s1689_s27 + $0x190] sm:$0xff]  ;;  %v1323_v18 = vpack.c.bf16 %v165_v15, %v164_v13  ;;  %p1558_p3 = pnand %p1557_p2, %p1551_p13 }
  0x1b   : > { %v1320_v10 = vpack.c.bf16 %v147_v8, %v146_v7  ;;  %v178_v11 = vld [vmem:[%s1689_s27 + $0x100] sm:$0xff]  ;;  %v179_v12 = vld [vmem:[%s1689_s27 + $0x108] sm:$0xff]  ;;  %1319 = vmatprep.subr.msk.bf16.mxu0 %vm1693_vm1, %v1317_v5  ;;  %v197_v17 = vld [vmem:[%s1689_s27 + $0x198] sm:$0xff] }
  0x1c   : > { %v1368_v14 = vpack.c.bf16 %v179_v12, %v178_v11  ;;  %1367 = vmatprep.subr.msk.bf16.mxu1 %vm1693_vm1, %v1365_v9  ;;  %v1371_v19 = vpack.c.bf16 %v197_v17, %v196_v16  ;;  %v148_v20 = vld [vmem:[%s1689_s27 + $0x10] sm:$0xff]  ;;  %v149_v21 = vld [vmem:[%s1689_s27 + $0x18] sm:$0xff]  ;;  %v166_v24 = vld [vmem:[%s1689_s27 + $0xa0] sm:$0xff] }
  0x1d   : > { %1322 = vmatpush3.bf16.xpose.msk.msra.mxu0 %vm1693_vm1, %v1320_v10  ;;  %v180_v22 = vld [vmem:[%s1689_s27 + $0x110] sm:$0xff]  ;;  %v181_v23 = vld [vmem:[%s1689_s27 + $0x118] sm:$0xff]  ;;  %v167_v25 = vld [vmem:[%s1689_s27 + $0xa8] sm:$0xff]  ;;  %v1326_v28 = vpack.c.bf16 %v149_v21, %v148_v20 }
  0x1e   : > { %1370 = vmatpush3.bf16.xpose.msk.msra.mxu1 %vm1693_vm1, %v1368_v14  ;;  %1325 = vmatprep.subr.msk.bf16.mxu0 %vm1693_vm1, %v1323_v18  ;;  %v198_v26 = vld [vmem:[%s1689_s27 + $0x1a0] sm:$0xff]  ;;  %v199_v27 = vld [vmem:[%s1689_s27 + $0x1a8] sm:$0xff]  ;;  %v1374_v29 = vpack.c.bf16 %v181_v23, %v180_v22  ;;  %v1329_v30 = vpack.c.bf16 %v167_v25, %v166_v24  ;;  %v168_v36 = vld [vmem:[%s1689_s27 + $0xb0] sm:$0xff] }
  0x1f   : > { %1373 = vmatprep.subr.msk.bf16.mxu1 %vm1693_vm1, %v1371_v19  ;;  %v1377_v31 = vpack.c.bf16 %v199_v27, %v198_v26  ;;  %v150_v32 = vld [vmem:[%s1689_s27 + $0x20] sm:$0xff]  ;;  %v151_v33 = vld [vmem:[%s1689_s27 + $0x28] sm:$0xff]  ;;  %v169_v37 = vld [vmem:[%s1689_s27 + $0xb8] sm:$0xff] }
  0x20   : > { %v182_v34 = vld [vmem:[%s1689_s27 + $0x120] sm:$0xff]  ;;  %v183_v35 = vld [vmem:[%s1689_s27 + $0x128] sm:$0xff]  ;;  %v200_v38 = vld [vmem:[%s1689_s27 + $0x1b0] sm:$0xff]  ;;  %v1332_v40 = vpack.c.bf16 %v151_v33, %v150_v32  ;;  %v1335_v42 = vpack.c.bf16 %v169_v37, %v168_v36 }
  0x21   : > { %v201_v39 = vld [vmem:[%s1689_s27 + $0x1b8] sm:$0xff]  ;;  %v1380_v41 = vpack.c.bf16 %v183_v35, %v182_v34  ;;  %v152_v44 = vld [vmem:[%s1689_s27 + $0x30] sm:$0xff]  ;;  %v170_v48 = vld [vmem:[%s1689_s27 + $0xc0] sm:$0xff] }
  0x22   : > { %v1383_v43 = vpack.c.bf16 %v201_v39, %v200_v38  ;;  %v153_v45 = vld [vmem:[%s1689_s27 + $0x38] sm:$0xff]  ;;  %v184_v46 = vld [vmem:[%s1689_s27 + $0x130] sm:$0xff]  ;;  %v171_v49 = vld [vmem:[%s1689_s27 + $0xc8] sm:$0xff] }
  0x23   : > { %v185_v47 = vld [vmem:[%s1689_s27 + $0x138] sm:$0xff]  ;;  %v202_v50 = vld [vmem:[%s1689_s27 + $0x1c0] sm:$0xff]  ;;  %v203_v51 = vld [vmem:[%s1689_s27 + $0x1c8] sm:$0xff]  ;;  %v1338_v52 = vpack.c.bf16 %v153_v45, %v152_v44  ;;  %v1341_v54 = vpack.c.bf16 %v171_v49, %v170_v48 }
  0x24   : > { %v1386_v53 = vpack.c.bf16 %v185_v47, %v184_v46  ;;  %v1389_v55 = vpack.c.bf16 %v203_v51, %v202_v50  ;;  %v154_v56 = vld [vmem:[%s1689_s27 + $0x40] sm:$0xff]  ;;  %v155_v57 = vld [vmem:[%s1689_s27 + $0x48] sm:$0xff]  ;;  %v172_v60 = vld [vmem:[%s1689_s27 + $0xd0] sm:$0xff] }
  0x25   : > { %1328 = vmatpush3.bf16.xpose.msk.msra.mxu0 %vm1693_vm1, %v1326_v28  ;;  %v186_v58 = vld [vmem:[%s1689_s27 + $0x140] sm:$0xff]  ;;  %v187_v59 = vld [vmem:[%s1689_s27 + $0x148] sm:$0xff]  ;;  %v173_v61 = vld [vmem:[%s1689_s27 + $0xd8] sm:$0xff]  ;;  %v1344_v2 = vpack.c.bf16 %v155_v57, %v154_v56 }
  0x26   : > { %1376 = vmatpush3.bf16.xpose.msk.msra.mxu1 %vm1693_vm1, %v1374_v29  ;;  %1331 = vmatprep.subr.msk.bf16.mxu0 %vm1693_vm1, %v1329_v30  ;;  %v204_v62 = vld [vmem:[%s1689_s27 + $0x1d0] sm:$0xff]  ;;  %v205_v63 = vld [vmem:[%s1689_s27 + $0x1d8] sm:$0xff]  ;;  %v1392_v3 = vpack.c.bf16 %v187_v59, %v186_v58  ;;  %v1347_v4 = vpack.c.bf16 %v173_v61, %v172_v60  ;;  %v174_v10 = vld [vmem:[%s1689_s27 + $0xe0] sm:$0xff] }
  0x27   : > { %1379 = vmatprep.subr.msk.bf16.mxu1 %vm1693_vm1, %v1377_v31  ;;  %v1395_v5 = vpack.c.bf16 %v205_v63, %v204_v62  ;;  %v156_v6 = vld [vmem:[%s1689_s27 + $0x50] sm:$0xff]  ;;  %v157_v7 = vld [vmem:[%s1689_s27 + $0x58] sm:$0xff]  ;;  %v175_v11 = vld [vmem:[%s1689_s27 + $0xe8] sm:$0xff] }
  0x28   : > { %v188_v8 = vld [vmem:[%s1689_s27 + $0x150] sm:$0xff]  ;;  %v189_v9 = vld [vmem:[%s1689_s27 + $0x158] sm:$0xff]  ;;  %v206_v12 = vld [vmem:[%s1689_s27 + $0x1e0] sm:$0xff]  ;;  %v1350_v14 = vpack.c.bf16 %v157_v7, %v156_v6  ;;  %v1353_v16 = vpack.c.bf16 %v175_v11, %v174_v10 }
  0x29   : > { %v207_v13 = vld [vmem:[%s1689_s27 + $0x1e8] sm:$0xff]  ;;  %v1398_v15 = vpack.c.bf16 %v189_v9, %v188_v8  ;;  %v158_v18 = vld [vmem:[%s1689_s27 + $0x60] sm:$0xff]  ;;  %v176_v22 = vld [vmem:[%s1689_s27 + $0xf0] sm:$0xff] }
  0x2a   : > { %v1401_v17 = vpack.c.bf16 %v207_v13, %v206_v12  ;;  %v159_v19 = vld [vmem:[%s1689_s27 + $0x68] sm:$0xff]  ;;  %v190_v20 = vld [vmem:[%s1689_s27 + $0x160] sm:$0xff]  ;;  %v177_v23 = vld [vmem:[%s1689_s27 + $0xf8] sm:$0xff] }
  0x2b   : > { %v191_v21 = vld [vmem:[%s1689_s27 + $0x168] sm:$0xff]  ;;  %v208_v24 = vld [vmem:[%s1689_s27 + $0x1f0] sm:$0xff]  ;;  %v209_v25 = vld [vmem:[%s1689_s27 + $0x1f8] sm:$0xff]  ;;  %v1356_v26 = vpack.c.bf16 %v159_v19, %v158_v18  ;;  %v1359_v28 = vpack.c.bf16 %v177_v23, %v176_v22 }
  0x2c   : > { %v1404_v27 = vpack.c.bf16 %v191_v21, %v190_v20  ;;  %v1407_v29 = vpack.c.bf16 %v209_v25, %v208_v24  ;;  %v160_v30 = vld [vmem:[%s1689_s27 + $0x70] sm:$0xff]  ;;  %v161_v31 = vld [vmem:[%s1689_s27 + $0x78] sm:$0xff]  ;;  %v226_v34 = vld [vmem:[%s1689_s27 + $0x280] sm:$0xff] }
  0x2d   : > { %1334 = vmatpush3.bf16.xpose.msk.msra.mxu0 %vm1693_vm1, %v1332_v40  ;;  %v192_v32 = vld [vmem:[%s1689_s27 + $0x170] sm:$0xff]  ;;  %v193_v33 = vld [vmem:[%s1689_s27 + $0x178] sm:$0xff]  ;;  %v227_v35 = vld [vmem:[%s1689_s27 + $0x288] sm:$0xff]  ;;  %v1362_v38 = vpack.c.bf16 %v161_v31, %v160_v30 }
  0x2e   : > { %1382 = vmatpush3.bf16.xpose.msk.msra.mxu1 %vm1693_vm1, %v1380_v41  ;;  %1337 = vmatprep.subr.msk.bf16.mxu0 %vm1693_vm1, %v1335_v42  ;;  %v258_v36 = vld [vmem:[%s1689_s27 + $0x380] sm:$0xff]  ;;  %v259_v37 = vld [vmem:[%s1689_s27 + $0x388] sm:$0xff]  ;;  %v1410_v39 = vpack.c.bf16 %v193_v33, %v192_v32  ;;  %v1413_v40 = vpack.c.bf16 %v227_v35, %v226_v34  ;;  %v228_v46 = vld [vmem:[%s1689_s27 + $0x290] sm:$0xff] }
  0x2f   : > { %1385 = vmatprep.subr.msk.bf16.mxu1 %vm1693_vm1, %v1383_v43  ;;  %v1461_v41 = vpack.c.bf16 %v259_v37, %v258_v36  ;;  %v210_v42 = vld [vmem:[%s1689_s27 + $0x200] sm:$0xff]  ;;  %v211_v43 = vld [vmem:[%s1689_s27 + $0x208] sm:$0xff]  ;;  %v229_v47 = vld [vmem:[%s1689_s27 + $0x298] sm:$0xff] }
  0x30   : > { %v242_v44 = vld [vmem:[%s1689_s27 + $0x300] sm:$0xff]  ;;  %v243_v45 = vld [vmem:[%s1689_s27 + $0x308] sm:$0xff]  ;;  %v260_v48 = vld [vmem:[%s1689_s27 + $0x390] sm:$0xff]  ;;  %v1416_v50 = vpack.c.bf16 %v211_v43, %v210_v42 }
  0x31   : > { %v261_v49 = vld [vmem:[%s1689_s27 + $0x398] sm:$0xff]  ;;  %v1464_v51 = vpack.c.bf16 %v243_v45, %v242_v44  ;;  %v244_v56 = vld [vmem:[%s1689_s27 + $0x310] sm:$0xff]  ;;  %v230_v58 = vld [vmem:[%s1689_s27 + $0x2a0] sm:$0xff] }
  0x32   : > { %v245_v57 = vld [vmem:[%s1689_s27 + $0x318] sm:$0xff]  ;;  %v231_v59 = vld [vmem:[%s1689_s27 + $0x2a8] sm:$0xff]  ;;  %v262_v60 = vld [vmem:[%s1689_s27 + $0x3a0] sm:$0xff] }
  0x33   : > { %v263_v61 = vld [vmem:[%s1689_s27 + $0x3a8] sm:$0xff]  ;;  %v1470_v63 = vpack.c.bf16 %v245_v57, %v244_v56  ;;  %v246_v6 = vld [vmem:[%s1689_s27 + $0x320] sm:$0xff]  ;;  %v232_v8 = vld [vmem:[%s1689_s27 + $0x2b0] sm:$0xff] }
  0x34   : > { %v247_v7 = vld [vmem:[%s1689_s27 + $0x328] sm:$0xff]  ;;  %v233_v9 = vld [vmem:[%s1689_s27 + $0x2b8] sm:$0xff]  ;;  %v264_v10 = vld [vmem:[%s1689_s27 + $0x3b0] sm:$0xff] }
  0x35   : > { %1340 = vmatpush3.bf16.xpose.msk.msra.mxu0 %vm1693_vm1, %v1338_v52  ;;  %v1419_v52 = vpack.c.bf16 %v229_v47, %v228_v46  ;;  %v265_v11 = vld [vmem:[%s1689_s27 + $0x3b8] sm:$0xff]  ;;  %v1476_v13 = vpack.c.bf16 %v247_v7, %v246_v6  ;;  %v248_v18 = vld [vmem:[%s1689_s27 + $0x330] sm:$0xff]  ;;  %v234_v20 = vld [vmem:[%s1689_s27 + $0x2c0] sm:$0xff] }
  0x36   : > { %1388 = vmatpush3.bf16.xpose.msk.msra.mxu1 %vm1693_vm1, %v1386_v53  ;;  %1343 = vmatprep.subr.msk.bf16.mxu0 %vm1693_vm1, %v1341_v54  ;;  %v1467_v53 = vpack.c.bf16 %v261_v49, %v260_v48  ;;  %v212_v54 = vld [vmem:[%s1689_s27 + $0x210] sm:$0xff]  ;;  %v249_v19 = vld [vmem:[%s1689_s27 + $0x338] sm:$0xff]  ;;  %v235_v21 = vld [vmem:[%s1689_s27 + $0x2c8] sm:$0xff] }
  0x37   : > { %1391 = vmatprep.subr.msk.bf16.mxu1 %vm1693_vm1, %v1389_v55  ;;  %v213_v55 = vld [vmem:[%s1689_s27 + $0x218] sm:$0xff]  ;;  %v266_v22 = vld [vmem:[%s1689_s27 + $0x3c0] sm:$0xff]  ;;  %v267_v23 = vld [vmem:[%s1689_s27 + $0x3c8] sm:$0xff]  ;;  %v1482_v25 = vpack.c.bf16 %v249_v19, %v248_v18 }
  0x38   : > { %v1422_v62 = vpack.c.bf16 %v213_v55, %v212_v54  ;;  %v250_v30 = vld [vmem:[%s1689_s27 + $0x340] sm:$0xff]  ;;  %v251_v31 = vld [vmem:[%s1689_s27 + $0x348] sm:$0xff]  ;;  %v236_v32 = vld [vmem:[%s1689_s27 + $0x2d0] sm:$0xff] }
  0x39   : > { %v237_v33 = vld [vmem:[%s1689_s27 + $0x2d8] sm:$0xff]  ;;  %v268_v34 = vld [vmem:[%s1689_s27 + $0x3d0] sm:$0xff]  ;;  %v1488_v37 = vpack.c.bf16 %v251_v31, %v250_v30  ;;  %v238_v44 = vld [vmem:[%s1689_s27 + $0x2e0] sm:$0xff] }
  0x3a   : > { %v269_v35 = vld [vmem:[%s1689_s27 + $0x3d8] sm:$0xff]  ;;  %v252_v42 = vld [vmem:[%s1689_s27 + $0x350] sm:$0xff]  ;;  %v239_v45 = vld [vmem:[%s1689_s27 + $0x2e8] sm:$0xff] }
  0x3b   : > { %v253_v43 = vld [vmem:[%s1689_s27 + $0x358] sm:$0xff]  ;;  %v270_v46 = vld [vmem:[%s1689_s27 + $0x3e0] sm:$0xff]  ;;  %v271_v47 = vld [vmem:[%s1689_s27 + $0x3e8] sm:$0xff] }
  0x3c   : > { %v1494_v49 = vpack.c.bf16 %v253_v43, %v252_v42  ;;  %v254_v54 = vld [vmem:[%s1689_s27 + $0x360] sm:$0xff]  ;;  %v255_v55 = vld [vmem:[%s1689_s27 + $0x368] sm:$0xff]  ;;  %v240_v56 = vld [vmem:[%s1689_s27 + $0x2f0] sm:$0xff] }
  0x3d   : > { %1346 = vmatpush3.bf16.xpose.msk.msra.mxu0 %vm1693_vm1, %v1344_v2  ;;  %v1425_v2 = vpack.c.bf16 %v231_v59, %v230_v58  ;;  %v241_v57 = vld [vmem:[%s1689_s27 + $0x2f8] sm:$0xff]  ;;  %v272_v58 = vld [vmem:[%s1689_s27 + $0x3f0] sm:$0xff] }
  0x3e   : > { %1394 = vmatpush3.bf16.xpose.msk.msra.mxu1 %vm1693_vm1, %v1392_v3  ;;  %1349 = vmatprep.subr.msk.bf16.mxu0 %vm1693_vm1, %v1347_v4  ;;  %v1473_v3 = vpack.c.bf16 %v263_v61, %v262_v60  ;;  %v214_v4 = vld [vmem:[%s1689_s27 + $0x220] sm:$0xff]  ;;  %v273_v59 = vld [vmem:[%s1689_s27 + $0x3f8] sm:$0xff]  ;;  %v1500_v61 = vpack.c.bf16 %v255_v55, %v254_v54 }
  0x3f   : > { %1397 = vmatprep.subr.msk.bf16.mxu1 %vm1693_vm1, %v1395_v5  ;;  %v215_v5 = vld [vmem:[%s1689_s27 + $0x228] sm:$0xff] }
  0x40   : > { %v1428_v12 = vpack.c.bf16 %v215_v5, %v214_v4  ;;  %v256_v4 = vld [vmem:[%s1689_s27 + $0x370] sm:$0xff]  ;;  %v257_v5 = vld [vmem:[%s1689_s27 + $0x378] sm:$0xff] }
  0x41   : > { %v1506_v7 = vpack.c.bf16 %v257_v5, %v256_v4 }
  0x45   : > { %1352 = vmatpush3.bf16.xpose.msk.msra.mxu0 %vm1693_vm1, %v1350_v14  ;;  %v1431_v14 = vpack.c.bf16 %v233_v9, %v232_v8 }
  0x46   : > { %1400 = vmatpush3.bf16.xpose.msk.msra.mxu1 %vm1693_vm1, %v1398_v15  ;;  %1355 = vmatprep.subr.msk.bf16.mxu0 %vm1693_vm1, %v1353_v16  ;;  %v1479_v15 = vpack.c.bf16 %v265_v11, %v264_v10  ;;  %v216_v16 = vld [vmem:[%s1689_s27 + $0x230] sm:$0xff] }
  0x47   : > { %1403 = vmatprep.subr.msk.bf16.mxu1 %vm1693_vm1, %v1401_v17  ;;  %v217_v17 = vld [vmem:[%s1689_s27 + $0x238] sm:$0xff] }
  0x48   : > { %v1434_v24 = vpack.c.bf16 %v217_v17, %v216_v16 }
  0x4d   : > { %1358 = vmatpush3.bf16.xpose.msk.msra.mxu0 %vm1693_vm1, %v1356_v26  ;;  %v1437_v26 = vpack.c.bf16 %v235_v21, %v234_v20 }
  0x4e   : > { %1406 = vmatpush3.bf16.xpose.msk.msra.mxu1 %vm1693_vm1, %v1404_v27  ;;  %1361 = vmatprep.subr.msk.bf16.mxu0 %vm1693_vm1, %v1359_v28  ;;  %v1485_v27 = vpack.c.bf16 %v267_v23, %v266_v22  ;;  %v218_v28 = vld [vmem:[%s1689_s27 + $0x240] sm:$0xff] }
  0x4f   : > { %1409 = vmatprep.subr.msk.bf16.mxu1 %vm1693_vm1, %v1407_v29  ;;  %v219_v29 = vld [vmem:[%s1689_s27 + $0x248] sm:$0xff] }
  0x50   : > { %v1440_v36 = vpack.c.bf16 %v219_v29, %v218_v28 }
  0x55   : > { %1364 = vmatpush3.bf16.xpose.msk.msra.mxu0 %vm1693_vm1, %v1362_v38  ;;  %v1443_v38 = vpack.c.bf16 %v237_v33, %v236_v32 }
  0x56   : > { %1412 = vmatpush3.bf16.xpose.msk.msra.mxu1 %vm1693_vm1, %v1410_v39  ;;  %1415 = vmatprep.subr.msk.bf16.mxu0 %vm1693_vm1, %v1413_v40  ;;  %v1491_v39 = vpack.c.bf16 %v269_v35, %v268_v34  ;;  %v220_v40 = vld [vmem:[%s1689_s27 + $0x250] sm:$0xff] }
  0x57   : > { %1463 = vmatprep.subr.msk.bf16.mxu1 %vm1693_vm1, %v1461_v41  ;;  %v221_v41 = vld [vmem:[%s1689_s27 + $0x258] sm:$0xff] }
  0x58   : > { %v1446_v48 = vpack.c.bf16 %v221_v41, %v220_v40 }
  0x5c   : > { %1214 = vmatmul.mubr.msk.f32.vlgmr.msra.gmra.mrb[0].mxu0 %vm274_vm0, %v1680_v0 }
  0x5d   : > { %1248 = vmatmul.mubr.msk.f32.vlgmr.msra.gmra.mrb[0].mxu1 %vm274_vm0, %v1680_v0  ;;  %1418 = vmatpush3.bf16.xpose.msk.msra.mxu0 %vm1693_vm1, %v1416_v50  ;;  %v1449_v50 = vpack.c.bf16 %v239_v45, %v238_v44 }
  0x5e   : > { %1466 = vmatpush3.bf16.xpose.msk.msra.mxu1 %vm1693_vm1, %v1464_v51  ;;  %1421 = vmatprep.subr.msk.bf16.mxu0 %vm1693_vm1, %v1419_v52  ;;  %v1497_v51 = vpack.c.bf16 %v271_v47, %v270_v46  ;;  %v222_v52 = vld [vmem:[%s1689_s27 + $0x260] sm:$0xff] }
  0x5f   : > { %1469 = vmatprep.subr.msk.bf16.mxu1 %vm1693_vm1, %v1467_v53  ;;  %1281 = vmatprep.mubr.msk.f32.mxu0 %vm274_vm0, %v1680_v0  ;;  %v223_v53 = vld [vmem:[%s1689_s27 + $0x268] sm:$0xff] }
  0x60   : > { %1315 = vmatprep.mubr.msk.f32.mxu1 %vm274_vm0, %v1680_v0  ;;  %v1452_v60 = vpack.c.bf16 %v223_v53, %v222_v52 }
  0x65   : > { %1424 = vmatpush3.bf16.xpose.msk.msra.mxu0 %vm1693_vm1, %v1422_v62  ;;  %v1455_v62 = vpack.c.bf16 %v241_v57, %v240_v56 }
  0x66   : > { %1472 = vmatpush3.bf16.xpose.msk.msra.mxu1 %vm1693_vm1, %v1470_v63  ;;  %1427 = vmatprep.subr.msk.bf16.mxu0 %vm1693_vm1, %v1425_v2  ;;  %v1503_v63 = vpack.c.bf16 %v273_v59, %v272_v58  ;;  %v224_v2 = vld [vmem:[%s1689_s27 + $0x270] sm:$0xff] }
  0x67   : > { %1475 = vmatprep.subr.msk.bf16.mxu1 %vm1693_vm1, %v1473_v3  ;;  %v225_v3 = vld [vmem:[%s1689_s27 + $0x278] sm:$0xff] }
  0x68   : > { %v1458_v6 = vpack.c.bf16 %v225_v3, %v224_v2 }
  0x6d   : > { %1430 = vmatpush3.bf16.xpose.msk.msra.mxu0 %vm1693_vm1, %v1428_v12 }
  0x6e   : > { %1478 = vmatpush3.bf16.xpose.msk.msra.mxu1 %vm1693_vm1, %v1476_v13  ;;  %1433 = vmatprep.subr.msk.bf16.mxu0 %vm1693_vm1, %v1431_v14 }
  0x6f   : > { %1481 = vmatprep.subr.msk.bf16.mxu1 %vm1693_vm1, %v1479_v15 }
  0x75   : > { %1436 = vmatpush3.bf16.xpose.msk.msra.mxu0 %vm1693_vm1, %v1434_v24 }
  0x76   : > { %1484 = vmatpush3.bf16.xpose.msk.msra.mxu1 %vm1693_vm1, %v1482_v25  ;;  %1439 = vmatprep.subr.msk.bf16.mxu0 %vm1693_vm1, %v1437_v26 }
  0x77   : > { %1487 = vmatprep.subr.msk.bf16.mxu1 %vm1693_vm1, %v1485_v27 }
  0x7d   : > { %1442 = vmatpush3.bf16.xpose.msk.msra.mxu0 %vm1693_vm1, %v1440_v36 }
  0x7e   : > { %1490 = vmatpush3.bf16.xpose.msk.msra.mxu1 %vm1693_vm1, %v1488_v37  ;;  %1445 = vmatprep.subr.msk.bf16.mxu0 %vm1693_vm1, %v1443_v38 }
  0x7f   : > { %1493 = vmatprep.subr.msk.bf16.mxu1 %vm1693_vm1, %v1491_v39 }
  0x85   : > { %1448 = vmatpush3.bf16.xpose.msk.msra.mxu0 %vm1693_vm1, %v1446_v48 }
  0x86   : > { %1496 = vmatpush3.bf16.xpose.msk.msra.mxu1 %vm1693_vm1, %v1494_v49  ;;  %1451 = vmatprep.subr.msk.bf16.mxu0 %vm1693_vm1, %v1449_v50 }
  0x87   : > { %1499 = vmatprep.subr.msk.bf16.mxu1 %vm1693_vm1, %v1497_v51 }
  0x8d   : > { %1454 = vmatpush3.bf16.xpose.msk.msra.mxu0 %vm1693_vm1, %v1452_v60 }
  0x8e   : > { %1502 = vmatpush3.bf16.xpose.msk.msra.mxu1 %vm1693_vm1, %v1500_v61  ;;  %1457 = vmatprep.subr.msk.bf16.mxu0 %vm1693_vm1, %v1455_v62 }
  0x8f   : > { %1505 = vmatprep.subr.msk.bf16.mxu1 %vm1693_vm1, %v1503_v63 }
  0x95   : > { %1460 = vmatpush3.bf16.xpose.msk.msra.mxu0 %vm1693_vm1, %v1458_v6 }
  0x96   : > { %1508 = vmatpush3.bf16.xpose.msk.msra.mxu1 %vm1693_vm1, %v1506_v7 }
  0x9c   : > { %1282 = vmatmul.mubr.msk.f32.vlgmr.msra.gmra.mrb[2].mxu0 %vm274_vm0, %v1680_v0 }
  0x9d   : > { %1316 = vmatmul.mubr.msk.f32.vlgmr.msra.gmra.mrb[2].mxu1 %vm274_vm0, %v1680_v0 }
 0x12f   : > { %v728_v8 = vpop.f32.mrb[0].mxu0 }
 0x130   : > { %v946_v9 = vsub.f32 0.0, %v728_v8  ;;  %v799_v10 = vpop.f32.mrb[0].mxu1  ;;  %v730_v11 = vpop.f32.mrb[1].mxu0 }
 0x131   : > { %v948_v12 = vsub.f32 0.0, %v799_v10  ;;  %v947_v13 = vsub.f32 0.0, %v730_v11  ;;  %v801_v14 = vpop.f32.mrb[1].mxu1 }
 0x132   : > { %954 = vst [vmem:[%s137_s30] sm:$0xff] %v946_v9  ;;  %v949_v1 = vsub.f32 0.0, %v801_v14 }
 0x133   : > { %956 = vst [vmem:[%s137_s30 + $0x10] sm:$0xff] %v948_v12  ;;  %955 = vst [vmem:[%s137_s30 + $0x8] sm:$0xff] %v947_v13 }
 0x134   : > { %957 = vst [vmem:[%s137_s30 + $0x18] sm:$0xff] %v949_v1 }
 0x16f   : > { %v870_v15 = vpop.f32.mrb[2].mxu0 }
 0x170   : > { %v950_v0 = vsub.f32 0.0, %v870_v15  ;;  %v941_v16 = vpop.f32.mrb[2].mxu1  ;;  %v872_v17 = vpop.f32.mrb[3].mxu0 }
 0x171   : > { %v952_v18 = vsub.f32 0.0, %v941_v16  ;;  %v951_v19 = vsub.f32 0.0, %v872_v17  ;;  %v943_v20 = vpop.f32.mrb[3].mxu1 }
 0x172   : > { %958 = vst [vmem:[%s137_s30 + $0x20] sm:$0xff] %v950_v0  ;;  %v953_v21 = vsub.f32 0.0, %v943_v20 }
 0x173   : > { %960 = vst [vmem:[%s137_s30 + $0x30] sm:$0xff] %v952_v18  ;;  %959 = vst [vmem:[%s137_s30 + $0x28] sm:$0xff] %v951_v19 }
 0x174   : > { %961 = vst [vmem:[%s137_s30 + $0x38] sm:$0xff] %v953_v21 }
 0x175   : > { %1561 = shalt.err (!%p1558_p3)
}
 0x176   : > { %s1562_s21 = scalar_lea.hbm %s1972_s7, 1024  ;;  %s1566_s24 = scalar_lea.hbm %s2018_s2, 2048 }
 0x177   : > { %p1563_p4 = scmp.ne.s32.totalorder %s1972_s7, %s1562_s21  ;;  %p1567_p9 = scmp.lt.u32.totalorder %s1972_s7, %s2018_s2 }
 0x178   : > { %p1568_p10 = scmp.lt.u32.totalorder %s1566_s24, %s1562_s21  ;;  %p1570_p12 = scmp.lt.u32.totalorder %s1562_s21, %s1972_s7 }
 0x179   : > { %p1564_p7 = pnand %p1563_p4, %p1666_p5 }
 0x17a   : > { %p1569_p11 = por %p1568_p10, %p1567_p9 }
 0x17b   : > { %p1565_p8 = pneg %p1564_p7 }
 0x17c   : > { %p1571_p13 = por %p1570_p12, %p1569_p11 }
 0x17e   : > { %p1572_p0 = pnand %p1571_p13, %p1565_p8 }
 0x180   : > { %1575 = shalt.err (!%p1572_p0)
}
 0x181   : > { %1509 = dma.vmem_to_hbm [thread:$0]  (%p1666_p5), %s1974_s4, 1024, %s1972_s7, %s963_s8  }
 0x182 PF: > { %p1515_p1 = scmp.ge.s32.totalorder %s1610_s12, 2  ;;  %s989_s27 = sand.u32 1, %s1598_s9  }
 0x183   : > { %s990_s28 = scalar_lea.sflag [#allocation3], %s989_s27 }
 0x184   : > { %p1512_p2 = pnand %p1515_p1, %p1670_p6 }
 0x186   : > { %1593 = dma.done.wait (!%p1512_p2), %s990_s28, 1024  }
 0x187   : > { %1595 = vsyncadd (!%p1512_p2), %s990_s28, 4294966272  ;;  %p12_p3 = scmp.ge.s32.totalorder %s1653_s15, 4   ;;  %s2023_s9 = smov %s1602_s10 }
 0x188   : > { %s2024_s10 = smov %s1606_s11  ;;  %s2025_s11 = smov %s1664_s18 }
 0x189   : > { %s2026_s12 = smov %s1653_s15  ;;  %14 = sbr.rel (!%p12_p3) target bundleno = 3 (0x3), region = 63 }
 0x190   :  { %995 = vsyncpa [#allocation3], 1 }
 0x191   :  { %997 = vsyncpa [#allocation3 + $0x1], 1 }

</bundles_post_ra>
